<compile_context>
chip_gen: v7x
topology: tpu7x:2x2x1
jax: 0.10.0
libtpu: 0.0.40
codegen_flags: <defaults>
</compile_context>

<pallas_src>
import functools

import jax
import jax.numpy as jnp
from jax.experimental import pallas as pl
from jax.experimental.pallas import tpu as pltpu

INPUT_DIM = 4      # CartPole-v1 observation_space.shape[0]
OUTPUT_DIM = 2     # CartPole-v1 action_space.n
HIDDEN = 24        # nn.Linear(..., 24) hidden width from the PyTorch module

LANE = 128         # TPU lane width; batch axis is padded/blocked in multiples of this
XPAD = 8           # input features padded 4 -> 8 sublanes (row 4 = constant-1 bias carrier)
HPAD = 32          # hidden width padded 24 -> 32 sublanes (unit 24 = constant-1 bias carrier)
OPAD = 8           # output padded 2 -> 8 sublanes

BIAS_COL1 = INPUT_DIM   # W1 column that carries fc1.bias (multiplies x row 4 == 1.0)
CARRIER = HIDDEN        # hidden unit index (24) used as the constant-1 carrier

# ---- packed parameter slab: (72, 32) f32 ------------------------------------
# rows  0..31 : W1p  (32, 32)  W1p[:24, :4] = fc1.weight, [:24, 4] = fc1.bias,
#                              W1p[24, 4] = 1.0 (carrier), rest 0
# rows 32..63 : W2p  (32, 32)  W2p[:24, :24] = fc2.weight, [:24, 24] = fc2.bias,
#                              W2p[24, 24] = 1.0 (carrier), rest 0
# rows 64..71 : W3p  (8, 32)   W3p[:2, :24] = fc3.weight, [:2, 24] = fc3.bias, rest 0
W1_ROW, W2_ROW, W3_ROW = 0, HPAD, 2 * HPAD           # 0, 32, 64
SLAB_ROWS = 2 * HPAD + OPAD                           # 72
SLAB_LANES = HPAD                                     # 32


def _round_up(n, m):
    return ((n + m - 1) // m) * m


def _cdiv(a, b):
    return (a + b - 1) // b


def dqn_kernel(x_ref, slab_ref, out_ref):
    # x_ref: (XPAD, bb) -- features on sublanes, batch on lanes, row 4 == 1.0.
    x = x_ref[...]
    w1 = slab_ref[W1_ROW:W1_ROW + HPAD, 0:XPAD]       # (32, 8)
    w2 = slab_ref[W2_ROW:W2_ROW + HPAD, :]            # (32, 32)
    w3 = slab_ref[W3_ROW:W3_ROW + OPAD, :]            # (8, 32)

    # Biases ride the matmuls via the constant-1 carrier row/unit.  Padded
    # weight rows/cols are zero, so padding never contaminates real outputs.
    h1 = jnp.maximum(jnp.dot(w1, x, preferred_element_type=jnp.float32), 0.0)   # (32, bb)
    h2 = jnp.maximum(jnp.dot(w2, h1, preferred_element_type=jnp.float32), 0.0)  # (32, bb)
    q = jnp.dot(w3, h2, preferred_element_type=jnp.float32)                     # (8, bb)

    out_ref[...] = q.astype(out_ref.dtype)            # lane-dense, unmasked (8, bb) store


def _grid_params(B, batch_block):
    """Pick a lane-aligned batch block.  Forces >= 2 grid steps once the padded
    batch reaches 256 so the 'parallel' axis can shard across both v7x TCs."""
    b128 = _round_up(max(B, 1), LANE)
    bb = min(_round_up(batch_block, LANE), b128)
    n = _cdiv(b128, bb)
    if n < 2 and b128 >= 2 * LANE:
        n = 2
    bb = _round_up(_cdiv(b128, n), LANE)
    return bb, n, bb * n


@functools.partial(jax.jit, static_argnames=("batch_block",))
def dqn_forward(x, slab, *, batch_block=2048):
    """x: (B, INPUT_DIM).  slab: (72, 32) packed params.  Returns (B, OUTPUT_DIM) Q-values."""
    B = x.shape[0]
    bb, n_blocks, B_pad = _grid_params(B, batch_block)

    # Batch-on-lanes input: rows 0:4 = x.T, row 4 = 1.0 (bias carrier), rows 5:8 = 0.
    # In a real RL loop, keep observations stored in this layout to skip this pad.
    xt = jnp.zeros((XPAD, B_pad), jnp.float32)
    xt = xt.at[:INPUT_DIM, :B].set(x.astype(jnp.float32).T)
    xt = xt.at[BIAS_COL1, :].set(1.0)

    flops = 2 * B_pad * (HPAD * XPAD + HPAD * HPAD + OPAD * HPAD)
    bytes_accessed = 4 * (XPAD * B_pad + SLAB_ROWS * SLAB_LANES + OPAD * B_pad)

    out = pl.pallas_call(
        dqn_kernel,
        out_shape=jax.ShapeDtypeStruct((OPAD, B_pad), jnp.float32),
        grid_spec=pltpu.PrefetchScalarGridSpec(
            num_scalar_prefetch=0,
            grid=(n_blocks,),
            in_specs=[
                pl.BlockSpec((XPAD, bb), lambda i: (0, i)),               # activations stream
                pl.BlockSpec((SLAB_ROWS, SLAB_LANES), lambda i: (0, 0)),  # weights stay resident
            ],
            out_specs=pl.BlockSpec((OPAD, bb), lambda i: (0, i)),
        ),
        compiler_params=pltpu.CompilerParams(
            dimension_semantics=("parallel",),        # megacore / v7x dual-TC sharding
        ),
        cost_estimate=pl.CostEstimate(
            flops=flops, transcendentals=0, bytes_accessed=bytes_accessed),
    )(xt, slab)

    # Rows 0:2 hold the real Q-values; padded rows/columns are sliced off here.
    return out[:OUTPUT_DIM, :B].T


def init_params(key):
    """PyTorch nn.Linear default init: U(-1/sqrt(fan_in), 1/sqrt(fan_in)).
    Weights stored PyTorch-style as (out_features, in_features)."""
    def linear(k, fan_in, fan_out):
        kw, kb = jax.random.split(k)
        bound = 1.0 / jnp.sqrt(jnp.float32(fan_in))
        w = jax.random.uniform(kw, (fan_out, fan_in), jnp.float32, -bound, bound)
        b = jax.random.uniform(kb, (fan_out,), jnp.float32, -bound, bound)
        return w, b

    k1, k2, k3 = jax.random.split(key, 3)
    w1, b1 = linear(k1, INPUT_DIM, HIDDEN)
    w2, b2 = linear(k2, HIDDEN, HIDDEN)
    w3, b3 = linear(k3, HIDDEN, OUTPUT_DIM)
    return (w1, b1, w2, b2, w3, b3)


def pack_params(w1, b1, w2, b2, w3, b3):
    """Pack PyTorch-layout (out, in) weights + (out,) biases into one f32 slab,
    with biases fused via the constant-1 carrier row/unit."""
    slab = jnp.zeros((SLAB_ROWS, SLAB_LANES), jnp.float32)
    # layer 1
    slab = slab.at[W1_ROW:W1_ROW + HIDDEN, :INPUT_DIM].set(w1)
    slab = slab.at[W1_ROW:W1_ROW + HIDDEN, BIAS_COL1].set(b1)
    slab = slab.at[W1_ROW + CARRIER, BIAS_COL1].set(1.0)      # carrier unit: relu(1*1) = 1
    # layer 2
    slab = slab.at[W2_ROW:W2_ROW + HIDDEN, :HIDDEN].set(w2)
    slab = slab.at[W2_ROW:W2_ROW + HIDDEN, CARRIER].set(b2)
    slab = slab.at[W2_ROW + CARRIER, CARRIER].set(1.0)        # propagate the carrier
    # layer 3
    slab = slab.at[W3_ROW:W3_ROW + OUTPUT_DIM, :HIDDEN].set(w3)
    slab = slab.at[W3_ROW:W3_ROW + OUTPUT_DIM, CARRIER].set(b3)
    return slab


def reference_forward(x, w1, b1, w2, b2, w3, b3):
    """Pure-JAX reference matching the PyTorch DQN.forward semantics."""
    h = jnp.maximum(x @ w1.T + b1, 0.0)
    h = jnp.maximum(h @ w2.T + b2, 0.0)
    return h @ w3.T + b3


if __name__ == "__main__":
    key = jax.random.PRNGKey(0)
    k_params, k_x = jax.random.split(key)

    params = init_params(k_params)
    slab = pack_params(*params)

    # Small deterministic batch (single grid step).
    B = 8
    x = jax.random.normal(k_x, (B, INPUT_DIM), dtype=jnp.float32)
    q = jax.block_until_ready(dqn_forward(x, slab))
    q_ref = reference_forward(x, *params)
    assert q.shape == (B, OUTPUT_DIM)
    assert jnp.allclose(q, q_ref, atol=1e-5, rtol=1e-5), float(
        jnp.max(jnp.abs(q - q_ref)))

    # Larger, non-lane-aligned batch exercising padding and the >=2-step
    # batch-parallel grid path (B=1000 -> B_pad=1024, two 512-wide blocks).
    B2 = 1000
    x2 = jax.random.normal(jax.random.PRNGKey(1), (B2, INPUT_DIM), dtype=jnp.float32)
    q2 = jax.block_until_ready(dqn_forward(x2, slab))
    q2_ref = reference_forward(x2, *params)
    assert q2.shape == (B2, OUTPUT_DIM)
    assert jnp.allclose(q2, q2_ref, atol=1e-4, rtol=1e-4)

    print("KERNEL_OK")
</pallas_src>

<mosaic_0001>
module attributes {stable_mosaic.version = 11 : i64} {
  func.func @dqn_kernel(%arg0: i32, %arg1: memref<8x128xf32, #tpu.memory_space<vmem>>, %arg2: memref<72x32xf32, #tpu.memory_space<vmem>>, %arg3: memref<8x128xf32, #tpu.memory_space<vmem>>) attributes {dimension_semantics = [#tpu.dimension_semantics<parallel>], iteration_bounds = array<i64: 1>, scalar_prefetch = 0 : i64, scratch_operands = 0 : i64, tpu.core_type = #tpu.core_type<tc>, window_params = [{transform_indices = @transform_0, window_bounds = array<i64: 8, 128>}, {pipeline_mode = #tpu.pipeline_mode<synchronous>, transform_indices = @transform_1, window_bounds = array<i64: 72, 32>}, {transform_indices = @transform_2, window_bounds = array<i64: 8, 128>}]} {
    %c0 = arith.constant 0 : index
    %c0_0 = arith.constant 0 : index
    %0 = vector.load %arg1[%c0, %c0_0] : memref<8x128xf32, #tpu.memory_space<vmem>>, vector<8x128xf32>
    %c0_1 = arith.constant 0 : index
    %c0_2 = arith.constant 0 : index
    %1 = vector.load %arg2[%c0_1, %c0_2] : memref<72x32xf32, #tpu.memory_space<vmem>>, vector<32x8xf32>
    %c32 = arith.constant 32 : index
    %c0_3 = arith.constant 0 : index
    %2 = vector.load %arg2[%c32, %c0_3] : memref<72x32xf32, #tpu.memory_space<vmem>>, vector<32x32xf32>
    %c64 = arith.constant 64 : index
    %c0_4 = arith.constant 0 : index
    %3 = vector.load %arg2[%c64, %c0_4] : memref<72x32xf32, #tpu.memory_space<vmem>>, vector<8x32xf32>
    %cst = arith.constant dense<0.000000e+00> : vector<32x128xf32>
    %4 = tpu.matmul %1, %0, %cst {dimension_numbers = #tpu.dot_dimension_numbers<[1], [0], [0], [1], [0, 0, 1, 1], [], []>} : vector<32x8xf32>, vector<8x128xf32>, vector<32x128xf32> -> vector<32x128xf32>
    %cst_5 = arith.constant 0.000000e+00 : f32
    %5 = vector.broadcast %cst_5 : f32 to vector<32x128xf32>
    %6 = arith.maximumf %4, %5 : vector<32x128xf32>
    %cst_6 = arith.constant dense<0.000000e+00> : vector<32x128xf32>
    %7 = tpu.matmul %2, %6, %cst_6 {dimension_numbers = #tpu.dot_dimension_numbers<[1], [0], [0], [1], [0, 0, 1, 1], [], []>} : vector<32x32xf32>, vector<32x128xf32>, vector<32x128xf32> -> vector<32x128xf32>
    %cst_7 = arith.constant 0.000000e+00 : f32
    %8 = vector.broadcast %cst_7 : f32 to vector<32x128xf32>
    %9 = arith.maximumf %7, %8 : vector<32x128xf32>
    %cst_8 = arith.constant dense<0.000000e+00> : vector<8x128xf32>
    %10 = tpu.matmul %3, %9, %cst_8 {dimension_numbers = #tpu.dot_dimension_numbers<[1], [0], [0], [1], [0, 0, 1, 1], [], []>} : vector<8x32xf32>, vector<32x128xf32>, vector<8x128xf32> -> vector<8x128xf32>
    %c0_9 = arith.constant 0 : index
    %c0_10 = arith.constant 0 : index
    %11 = vector.load %arg3[%c0_9, %c0_10] : memref<8x128xf32, #tpu.memory_space<vmem>>, vector<8x128xf32>
    tpu.vector_store %arg3[%c0_9, %c0_10], %10 {strides = array<i32>} : memref<8x128xf32, #tpu.memory_space<vmem>>, vector<8x128xf32>,
    return
  }
  func.func @transform_0(%arg0: i32) -> (i32, i32) {
    %c0_i32 = arith.constant 0 : i32
    %c0_i32_0 = arith.constant 0 : i32
    return %c0_i32, %arg0 : i32, i32
  }
  func.func @transform_1(%arg0: i32) -> (i32, i32) {
    %c0_i32 = arith.constant 0 : i32
    %c0_i32_0 = arith.constant 0 : i32
    %c0_i32_1 = arith.constant 0 : i32
    return %c0_i32, %c0_i32_0 : i32, i32
  }
  func.func @transform_2(%arg0: i32) -> (i32, i32) {
    %c0_i32 = arith.constant 0 : i32
    %c0_i32_0 = arith.constant 0 : i32
    return %c0_i32, %arg0 : i32, i32
  }
}

</mosaic_0001>

<bundles_post_ra>
// kernel: dqn_forward.1
= control target key start
LH: loop header
LB: loop body
LE: loop exit
PB: predicated region body
PF: predicated region fallthrough
CT: control target
= control target key end

     0   :  { %vm21_vm0 = vcmask 64512   ;;  %vm123_vm1 = vcmask 261120   ;;  %v380_v19 = vmov 0.0|0.0   ;;  %vm381_vm2 = vmmov 0   ;;  %s436_s0 = inlined_call_operand.vmem [shape: f32[8,128], index: 0, kind: input, shape index: {}]   ;;  %s437_s1 = inlined_call_operand.vmem [shape: f32[72,32], index: 1, kind: input, shape index: {}]   ;;  %s438_s2 = inlined_call_operand.vmem [shape: f32[8,128], index: 2, kind: output, shape index: {}]  }
   0x1   :  { %v11_v0 = vld [vmem:[%s436_s0] sm:$0xff]  ;;  %v13_v2 = vld [vmem:[%s437_s1 + $0x8] sm:$0xff]  ;;  %v14_v3 = vld [vmem:[%s437_s1 + $0x10] sm:$0xff]  ;;  %v382_v20 = vmov 0.0  }
   0x2   :  { %v12_v1 = vld [vmem:[%s437_s1] sm:$0xff]  ;;  %330 = vmatprep.subr.mxu0 %v11_v0  ;;  %v15_v4 = vld [vmem:[%s437_s1 + $0x18] sm:$0xff]  ;;  %v17_v16 = vld [vmem:[%s437_s1 + $0x28] sm:$0xff] }
   0x3   :  { %332 = vmatprep.mubr.msk.f32.mxu0 %vm21_vm0, %v12_v1  ;;  %331 = vmatpush3.msra.mxu0 %v11_v0  ;;  %v16_v5 = vld [vmem:[%s437_s1 + $0x20] sm:$0xff]  ;;  %v18_v17 = vld [vmem:[%s437_s1 + $0x30] sm:$0xff]  ;;  %v19_v18 = vld [vmem:[%s437_s1 + $0x38] sm:$0xff] }
   0x4   :  { %333 = vmatmul.mubr.msk.f32.vlgmr.msra.gmra.mrb[0].mxu0 %vm21_vm0, %v13_v2  ;;  %346 = vmatprep.mubr.msk.f32.mxu1 %vm123_vm1, %v16_v5  ;;  %v20_v31 = vld [vmem:[%s437_s1 + $0x40] sm:$0xff] }
   0x5   :  { %335 = vmatprep.mubr.msk.f32.mxu0 %vm21_vm0, %v14_v3  ;;  %371 = vmatprep.subr.bf16.mxu0 %v380_v19 }
   0x8   :  { %336 = vmatmul.mubr.msk.f32.gmra.mrb[2].mxu0 %vm21_vm0, %v15_v4 }
   0x9   :  { %360 = vmatprep.mubr.msk.f32.mxu0 %vm381_vm2, %v382_v20 }
  0xd7   :  { %v334_v6 = vpop.f32.mrb[0].mxu0 }
  0xd8   :  { %v120_v7 = vmax.f32 %v334_v6, 0.0  ;;  %v100_v8 = vpop.f32.mrb[1].mxu0 }
  0xd9   :  { %v119_v9 = vmax.f32 %v100_v8, 0.0 }
  0xdb   :  { %v337_v10 = vpop.f32.mrb[2].mxu0  ;;  %v363_v11 = vpack.c.bf16 %v120_v7, %v119_v9 }
  0xdc   :  { %v122_v12 = vmax.f32 %v337_v10, 0.0  ;;  %v110_v13 = vpop.f32.mrb[3].mxu0 }
  0xdd   :  { %v121_v14 = vmax.f32 %v110_v13, 0.0  ;;  %364 = vmatprep.subr.bf16.mxu1 %v363_v11 }
  0xde   :  { %366 = vmatpush3.bf16.msra.mxu1 %v363_v11 }
  0xdf   :  { %v367_v15 = vpack.c.bf16 %v122_v12, %v121_v14 }
  0xe1   :  { %368 = vmatprep.subr.bf16.mxu1 %v367_v15 }
  0xe2   :  { %370 = vmatpush3.bf16.msra.mxu1 %v367_v15 }
  0xe5   :  { %347 = vmatmul.mubr.msk.f32.vlgmr.msra.gmra.mrb[0].mxu1 %vm123_vm1, %v17_v16 }
  0xe6   :  { %349 = vmatprep.mubr.msk.f32.mxu1 %vm123_vm1, %v18_v17 }
  0xe9   :  { %350 = vmatmul.mubr.msk.f32.gmra.mrb[2].mxu1 %vm123_vm1, %v19_v18 }
 0x1b8   :  { %v348_v21 = vpop.f32.mrb[0].mxu1 }
 0x1b9   :  { %v222_v22 = vmax.f32 %v348_v21, 0.0  ;;  %v202_v23 = vpop.f32.mrb[1].mxu1 }
 0x1ba   :  { %v221_v24 = vmax.f32 %v202_v23, 0.0 }
 0x1bc   :  { %v372_v25 = vpack.c.bf16 %v222_v22, %v221_v24  ;;  %v351_v26 = vpop.f32.mrb[2].mxu1 }
 0x1bd   :  { %v224_v27 = vmax.f32 %v351_v26, 0.0  ;;  %v212_v28 = vpop.f32.mrb[3].mxu1 }
 0x1be   :  { %v223_v29 = vmax.f32 %v212_v28, 0.0  ;;  %373 = vmatpush3.bf16.msra.mxu0 %v372_v25 }
 0x1bf   :  { %374 = vmatprep.subr.bf16.mxu0 %v380_v19 }
 0x1c0   :  { %v375_v30 = vpack.c.bf16 %v224_v27, %v223_v29 }
 0x1c2   :  { %376 = vmatpush3.bf16.msra.mxu0 %v375_v30 }
 0x1c5   :  { %361 = vmatmul.mubr.msk.f32.vlgmr.msra.gmra.mrb[4].mxu0 %vm123_vm1, %v20_v31 }
 0x298   :  { %v294_v32 = vpop.f32.mrb[4].mxu0 }
 0x299   :  { %298 = vst [vmem:[%s438_s2] sm:$0xff] %v294_v32  ;;  %v362_v33 = vpop.f32.mrb[5].mxu0 }

</bundles_post_ra>
